<compile_context>
chip_gen: v7x
topology: tpu7x:2x2x1
jax: 0.10.0
libtpu: 0.0.40
codegen_flags: <defaults>
</compile_context>

<pallas_src>
import jax
import jax.numpy as jnp
import numpy as np
from jax import lax
from jax.experimental import pallas as pl
from jax.experimental.pallas import tpu as pltpu


def _deep_attn_kernel(x1_ref, x2_ref, v_ref, mb_ref, w1_ref, w2_ref, b2_ref,
                      o_ref):
    # x1_ref: (1, TQ, D1)   x2_ref: (1, L2, D2)   v_ref: (1, 1, L2, D3)
    # mb_ref: (1, 1, L2)    w1_ref: (1, D1, H)    w2_ref: (1, D2, H)
    # b2_ref: (1, 1, H)     o_ref:  (1, 1, TQ, D3)
    x1 = x1_ref[0].astype(jnp.float32)                      # (TQ, D1)
    x2 = x2_ref[0].astype(jnp.float32)                      # (L2, D2)
    w1 = w1_ref[0].astype(jnp.float32)                      # (D1, H)
    w2 = w2_ref[0].astype(jnp.float32)                      # (D2, H)
    b2 = b2_ref[0].astype(jnp.float32)                      # (1, H)

    q = jnp.maximum(
        jnp.dot(x1, w1, preferred_element_type=jnp.float32), 0.0)   # (TQ, H)
    k = jnp.maximum(
        jnp.dot(x2, w2, preferred_element_type=jnp.float32) + b2, 0.0)  # (L2, H)

    # logits = q @ k^T  (contract over H for both operands)
    logits = lax.dot_general(q, k, (((1,), (1,)), ((), ())),
                             preferred_element_type=jnp.float32)     # (TQ, L2)
    logits = logits + mb_ref[0]                                      # mask: +(-inf)/0

    m = jnp.max(logits, axis=-1, keepdims=True)
    p = jnp.exp(logits - m)
    prob = p / jnp.sum(p, axis=-1, keepdims=True)                    # (TQ, L2)

    v = v_ref[0, 0].astype(jnp.float32)                              # (L2, D3)
    attn = jnp.dot(prob, v, preferred_element_type=jnp.float32)      # (TQ, D3)
    o_ref[0, 0] = attn.astype(o_ref.dtype)


def deep_attention_forward(x1, x2, x3_list, x2_mask, w1_list, w2_list, b2_list):
    """
    x1:        (B, L1, D1) float
    x2:        (B, L2, D2) float
    x3_list:   list of (B, L2, D3)   (all heads must share the same D3 here)
    x2_mask:   (B, L2) bool (True = masked key)
    w1_list[i]: (H, D1)  proj_1 weight (nn.Linear layout, no bias)
    w2_list[i]: (H, D2)  proj_2 weight
    b2_list[i]: (H,)     proj_2 bias
    returns:   (B, L1, len(x3_list) * D3) float32
    """
    B, L1, D1 = x1.shape
    _, L2, D2 = x2.shape
    A = len(x3_list)
    D3 = x3_list[0].shape[-1]
    H = w1_list[0].shape[0]
    # TODO(synk): heads with differing x3 value dims would need per-group calls;
    # this implementation assumes a single shared D3 (the common configuration).
    assert all(v.shape == (B, L2, D3) for v in x3_list)

    # Stack head parameters / values so the head index is a grid axis.
    w1s = jnp.stack([jnp.asarray(w).T for w in w1_list])            # (A, D1, H)
    w2s = jnp.stack([jnp.asarray(w).T for w in w2_list])            # (A, D2, H)
    b2s = jnp.stack([jnp.asarray(b).reshape(1, H) for b in b2_list])  # (A, 1, H)
    vals = jnp.stack(x3_list)                                       # (A, B, L2, D3)

    # Additive mask bias: -inf where masked, 0 elsewhere (exact masked_fill).
    mask_bias = jnp.where(x2_mask, -jnp.inf, 0.0).astype(jnp.float32)
    mask_bias = mask_bias.reshape(B, 1, L2)

    # Query-row tile: whole L1 for small problems, large 8-aligned tiles else.
    if L1 % 256 == 0:
        tq = 256
    elif L1 % 128 == 0:
        tq = 128
    else:
        tq = L1

    grid = (B, L1 // tq, A)

    out = pl.pallas_call(
        _deep_attn_kernel,
        out_shape=jax.ShapeDtypeStruct((A, B, L1, D3), jnp.float32),
        grid_spec=pltpu.PrefetchScalarGridSpec(
            num_scalar_prefetch=0,
            grid=grid,
            in_specs=[
                pl.BlockSpec((1, tq, D1), lambda b, qi, a: (b, qi, 0)),      # x1
                pl.BlockSpec((1, L2, D2), lambda b, qi, a: (b, 0, 0)),       # x2
                pl.BlockSpec((1, 1, L2, D3), lambda b, qi, a: (a, b, 0, 0)),  # values
                pl.BlockSpec((1, 1, L2), lambda b, qi, a: (b, 0, 0)),        # mask bias
                pl.BlockSpec((1, D1, H), lambda b, qi, a: (a, 0, 0)),        # W1
                pl.BlockSpec((1, D2, H), lambda b, qi, a: (a, 0, 0)),        # W2
                pl.BlockSpec((1, 1, H), lambda b, qi, a: (a, 0, 0)),         # b2
            ],
            out_specs=pl.BlockSpec((1, 1, tq, D3),
                                   lambda b, qi, a: (a, b, qi, 0)),
        ),
        compiler_params=pltpu.CompilerParams(
            dimension_semantics=("parallel", "parallel", "arbitrary")),
    )(x1, x2, vals, mask_bias, w1s, w2s, b2s)

    # (A, B, L1, D3) -> concat over heads along the feature dim.
    return jnp.transpose(out, (1, 2, 0, 3)).reshape(B, L1, A * D3)


def _reference(x1, x2, x3_list, x2_mask, w1_list, w2_list, b2_list):
    outs = []
    for x3, w1, w2, b2 in zip(x3_list, w1_list, w2_list, b2_list):
        q = jax.nn.relu(x1 @ w1.T)
        k = jax.nn.relu(x2 @ w2.T + b2)
        logits = jnp.einsum('bqh,bkh->bqk', q, k)
        logits = jnp.where(x2_mask[:, None, :], -jnp.inf, logits)
        prob = jax.nn.softmax(logits, axis=-1)
        outs.append(jnp.einsum('bqk,bkd->bqd', prob, x3))
    return jnp.concatenate(outs, axis=2)


if __name__ == "__main__":
    B, L1, L2 = 2, 8, 8
    D1 = D2 = 32          # query dim must equal key dim (DotProductProject)
    H = 64                # DotProductProject default hidden_size
    D3 = 32               # value dim per head
    ATT_CNT = 2

    key = jax.random.PRNGKey(0)
    k1, k2, k3, km, kw = jax.random.split(key, 5)

    x1 = jax.random.normal(k1, (B, L1, D1), dtype=jnp.float32)
    x2 = jax.random.normal(k2, (B, L2, D2), dtype=jnp.float32)
    x3_list = [
        jax.random.normal(jax.random.fold_in(k3, i), (B, L2, D3),
                          dtype=jnp.float32)
        for i in range(ATT_CNT)
    ]
    x2_mask = jax.random.uniform(km, (B, L2)) < 0.3
    x2_mask = x2_mask.at[:, 0].set(False)   # keep >=1 unmasked key per row

    # Per-head DotProductProject parameters (nn.Linear default-style init).
    w1_list, w2_list, b2_list = [], [], []
    for i in range(ATT_CNT):
        kwi = jax.random.fold_in(kw, i)
        ka, kb, kc = jax.random.split(kwi, 3)
        b1 = 1.0 / np.sqrt(D1)
        b2b = 1.0 / np.sqrt(D2)
        w1_list.append(jax.random.uniform(ka, (H, D1), minval=-b1, maxval=b1,
                                          dtype=jnp.float32))
        w2_list.append(jax.random.uniform(kb, (H, D2), minval=-b2b, maxval=b2b,
                                          dtype=jnp.float32))
        b2_list.append(jax.random.uniform(kc, (H,), minval=-b2b, maxval=b2b,
                                          dtype=jnp.float32))

    # TODO(synk): dropout / att_dropout are identity at p=0 (module default);
    # weight_norm, scale_on, drop_diagonal and multihead_on branches are off
    # by default and omitted.
    out = deep_attention_forward(x1, x2, x3_list, x2_mask,
                                 w1_list, w2_list, b2_list)
    out = jax.block_until_ready(out)

    ref = _reference(x1, x2, x3_list, x2_mask, w1_list, w2_list, b2_list)
    assert out.shape == (B, L1, ATT_CNT * D3)
    assert bool(jnp.allclose(out, ref, atol=1e-4, rtol=1e-4)), \
        "mismatch vs reference"

    print("KERNEL_OK")
</pallas_src>

<mosaic_0001>
module attributes {stable_mosaic.version = 11 : i64} {
  func.func @_deep_attn_kernel(%arg0: i32, %arg1: i32, %arg2: i32, %arg3: memref<1x8x32xf32, #tpu.memory_space<vmem>>, %arg4: memref<1x8x32xf32, #tpu.memory_space<vmem>>, %arg5: memref<1x1x8x32xf32, #tpu.memory_space<vmem>>, %arg6: memref<1x1x8xf32, #tpu.memory_space<vmem>>, %arg7: memref<1x32x64xf32, #tpu.memory_space<vmem>>, %arg8: memref<1x32x64xf32, #tpu.memory_space<vmem>>, %arg9: memref<1x1x64xf32, #tpu.memory_space<vmem>>, %arg10: memref<1x1x8x32xf32, #tpu.memory_space<vmem>>) attributes {dimension_semantics = [#tpu.dimension_semantics<parallel>, #tpu.dimension_semantics<parallel>, #tpu.dimension_semantics<arbitrary>], iteration_bounds = array<i64: 2, 1, 2>, scalar_prefetch = 0 : i64, scratch_operands = 0 : i64, tpu.core_type = #tpu.core_type<tc>, window_params = [{transform_indices = @transform_0, window_bounds = array<i64: 1, 8, 32>}, {transform_indices = @transform_1, window_bounds = array<i64: 1, 8, 32>}, {transform_indices = @transform_2, window_bounds = array<i64: 1, 1, 8, 32>}, {transform_indices = @transform_3, window_bounds = array<i64: 1, 1, 8>}, {transform_indices = @transform_4, window_bounds = array<i64: 1, 32, 64>}, {transform_indices = @transform_5, window_bounds = array<i64: 1, 32, 64>}, {transform_indices = @transform_6, window_bounds = array<i64: 1, 1, 64>}, {transform_indices = @transform_7, window_bounds = array<i64: 1, 1, 8, 32>}]} {
    %c0 = arith.constant 0 : index
    %c0_0 = arith.constant 0 : index
    %c0_1 = arith.constant 0 : index
    %0 = vector.load %arg3[%c0, %c0_0, %c0_1] : memref<1x8x32xf32, #tpu.memory_space<vmem>>, vector<1x8x32xf32>
    %1 = vector.shape_cast %0 : vector<1x8x32xf32> to vector<8x32xf32>
    %c0_2 = arith.constant 0 : index
    %c0_3 = arith.constant 0 : index
    %c0_4 = arith.constant 0 : index
    %2 = vector.load %arg4[%c0_2, %c0_3, %c0_4] : memref<1x8x32xf32, #tpu.memory_space<vmem>>, vector<1x8x32xf32>
    %3 = vector.shape_cast %2 : vector<1x8x32xf32> to vector<8x32xf32>
    %c0_5 = arith.constant 0 : index
    %c0_6 = arith.constant 0 : index
    %c0_7 = arith.constant 0 : index
    %4 = vector.load %arg7[%c0_5, %c0_6, %c0_7] : memref<1x32x64xf32, #tpu.memory_space<vmem>>, vector<1x32x64xf32>
    %5 = vector.shape_cast %4 : vector<1x32x64xf32> to vector<32x64xf32>
    %c0_8 = arith.constant 0 : index
    %c0_9 = arith.constant 0 : index
    %c0_10 = arith.constant 0 : index
    %6 = vector.load %arg8[%c0_8, %c0_9, %c0_10] : memref<1x32x64xf32, #tpu.memory_space<vmem>>, vector<1x32x64xf32>
    %7 = vector.shape_cast %6 : vector<1x32x64xf32> to vector<32x64xf32>
    %c0_11 = arith.constant 0 : index
    %c0_12 = arith.constant 0 : index
    %c0_13 = arith.constant 0 : index
    %8 = vector.load %arg9[%c0_11, %c0_12, %c0_13] : memref<1x1x64xf32, #tpu.memory_space<vmem>>, vector<1x1x64xf32>
    %9 = vector.shape_cast %8 : vector<1x1x64xf32> to vector<1x64xf32>
    %cst = arith.constant dense<0.000000e+00> : vector<8x64xf32>
    %10 = tpu.matmul %1, %5, %cst {dimension_numbers = #tpu.dot_dimension_numbers<[1], [0], [0], [1], [0, 0, 1, 1], [], []>} : vector<8x32xf32>, vector<32x64xf32>, vector<8x64xf32> -> vector<8x64xf32>
    %cst_14 = arith.constant 0.000000e+00 : f32
    %11 = vector.broadcast %cst_14 : f32 to vector<8x64xf32>
    %12 = arith.maximumf %10, %11 : vector<8x64xf32>
    %cst_15 = arith.constant dense<0.000000e+00> : vector<8x64xf32>
    %13 = tpu.matmul %3, %7, %cst_15 {dimension_numbers = #tpu.dot_dimension_numbers<[1], [0], [0], [1], [0, 0, 1, 1], [], []>} : vector<8x32xf32>, vector<32x64xf32>, vector<8x64xf32> -> vector<8x64xf32>
    %14 = vector.broadcast %9 : vector<1x64xf32> to vector<8x64xf32>
    %15 = arith.addf %13, %14 : vector<8x64xf32>
    %cst_16 = arith.constant 0.000000e+00 : f32
    %16 = vector.broadcast %cst_16 : f32 to vector<8x64xf32>
    %17 = arith.maximumf %15, %16 : vector<8x64xf32>
    %cst_17 = arith.constant dense<0.000000e+00> : vector<8x8xf32>
    %18 = tpu.matmul %12, %17, %cst_17 {dimension_numbers = #tpu.dot_dimension_numbers<[1], [1], [0], [0], [0, 0, 1, 0], [], []>} : vector<8x64xf32>, vector<8x64xf32>, vector<8x8xf32> -> vector<8x8xf32>
    %c0_18 = arith.constant 0 : index
    %c0_19 = arith.constant 0 : index
    %c0_20 = arith.constant 0 : index
    %19 = vector.load %arg6[%c0_18, %c0_19, %c0_20] : memref<1x1x8xf32, #tpu.memory_space<vmem>>, vector<1x1x8xf32>
    %20 = vector.shape_cast %19 : vector<1x1x8xf32> to vector<1x8xf32>
    %21 = vector.broadcast %20 : vector<1x8xf32> to vector<8x8xf32>
    %22 = arith.addf %18, %21 : vector<8x8xf32>
    %cst_21 = arith.constant dense<0xFF800000> : vector<8xf32>
    %23 = vector.multi_reduction <maximumf>, %22, %cst_21 [1] : vector<8x8xf32> to vector<8xf32>
    %24 = vector.shape_cast %23 : vector<8xf32> to vector<8x1xf32>
    %25 = vector.broadcast %24 : vector<8x1xf32> to vector<8x8xf32>
    %26 = arith.subf %22, %25 : vector<8x8xf32>
    %27 = math.exp %26 : vector<8x8xf32>
    %cst_22 = arith.constant dense<0.000000e+00> : vector<8xf32>
    %28 = vector.multi_reduction <add>, %27, %cst_22 [1] : vector<8x8xf32> to vector<8xf32>
    %29 = vector.shape_cast %28 : vector<8xf32> to vector<8x1xf32>
    %30 = vector.broadcast %29 : vector<8x1xf32> to vector<8x8xf32>
    %31 = arith.divf %27, %30 : vector<8x8xf32>
    %c0_23 = arith.constant 0 : index
    %c0_24 = arith.constant 0 : index
    %c0_25 = arith.constant 0 : index
    %c0_26 = arith.constant 0 : index
    %32 = vector.load %arg5[%c0_23, %c0_24, %c0_25, %c0_26] : memref<1x1x8x32xf32, #tpu.memory_space<vmem>>, vector<1x1x8x32xf32>
    %33 = vector.shape_cast %32 : vector<1x1x8x32xf32> to vector<8x32xf32>
    %cst_27 = arith.constant dense<0.000000e+00> : vector<8x32xf32>
    %34 = tpu.matmul %31, %33, %cst_27 {dimension_numbers = #tpu.dot_dimension_numbers<[1], [0], [0], [1], [0, 0, 1, 1], [], []>} : vector<8x8xf32>, vector<8x32xf32>, vector<8x32xf32> -> vector<8x32xf32>
    %c0_28 = arith.constant 0 : index
    %c0_29 = arith.constant 0 : index
    %c0_30 = arith.constant 0 : index
    %c0_31 = arith.constant 0 : index
    %35 = vector.load %arg10[%c0_28, %c0_29, %c0_30, %c0_31] : memref<1x1x8x32xf32, #tpu.memory_space<vmem>>, vector<1x1x8x32xf32>
    %36 = vector.shape_cast %35 : vector<1x1x8x32xf32> to vector<8x32xf32>
    %37 = vector.shape_cast %34 : vector<8x32xf32> to vector<1x1x8x32xf32>
    tpu.vector_store %arg10[%c0_28, %c0_29, %c0_30, %c0_31], %37 {strides = array<i32>} : memref<1x1x8x32xf32, #tpu.memory_space<vmem>>, vector<1x1x8x32xf32>,
    return
  }
  func.func @transform_0(%arg0: i32, %arg1: i32, %arg2: i32) -> (i32, i32, i32) {
    %c0_i32 = arith.constant 0 : i32
    %c0_i32_0 = arith.constant 0 : i32
    return %arg0, %arg1, %c0_i32 : i32, i32, i32
  }
  func.func @transform_1(%arg0: i32, %arg1: i32, %arg2: i32) -> (i32, i32, i32) {
    %c0_i32 = arith.constant 0 : i32
    %c0_i32_0 = arith.constant 0 : i32
    %c0_i32_1 = arith.constant 0 : i32
    return %arg0, %c0_i32, %c0_i32_0 : i32, i32, i32
  }
  func.func @transform_2(%arg0: i32, %arg1: i32, %arg2: i32) -> (i32, i32, i32, i32) {
    %c0_i32 = arith.constant 0 : i32
    %c0_i32_0 = arith.constant 0 : i32
    %c0_i32_1 = arith.constant 0 : i32
    return %arg2, %arg0, %c0_i32, %c0_i32_0 : i32, i32, i32, i32
  }
  func.func @transform_3(%arg0: i32, %arg1: i32, %arg2: i32) -> (i32, i32, i32) {
    %c0_i32 = arith.constant 0 : i32
    %c0_i32_0 = arith.constant 0 : i32
    %c0_i32_1 = arith.constant 0 : i32
    return %arg0, %c0_i32, %c0_i32_0 : i32, i32, i32
  }
  func.func @transform_4(%arg0: i32, %arg1: i32, %arg2: i32) -> (i32, i32, i32) {
    %c0_i32 = arith.constant 0 : i32
    %c0_i32_0 = arith.constant 0 : i32
    %c0_i32_1 = arith.constant 0 : i32
    return %arg2, %c0_i32, %c0_i32_0 : i32, i32, i32
  }
  func.func @transform_5(%arg0: i32, %arg1: i32, %arg2: i32) -> (i32, i32, i32) {
    %c0_i32 = arith.constant 0 : i32
    %c0_i32_0 = arith.constant 0 : i32
    %c0_i32_1 = arith.constant 0 : i32
    return %arg2, %c0_i32, %c0_i32_0 : i32, i32, i32
  }
  func.func @transform_6(%arg0: i32, %arg1: i32, %arg2: i32) -> (i32, i32, i32) {
    %c0_i32 = arith.constant 0 : i32
    %c0_i32_0 = arith.constant 0 : i32
    %c0_i32_1 = arith.constant 0 : i32
    return %arg2, %c0_i32, %c0_i32_0 : i32, i32, i32
  }
  func.func @transform_7(%arg0: i32, %arg1: i32, %arg2: i32) -> (i32, i32, i32, i32) {
    %c0_i32 = arith.constant 0 : i32
    %c0_i32_0 = arith.constant 0 : i32
    return %arg2, %arg0, %arg1, %c0_i32 : i32, i32, i32, i32
  }
}

</mosaic_0001>

<bundles_post_ra>
// kernel: tpu_custom_call.1
= control target key start
LH: loop header
LB: loop body
LE: loop exit
PB: predicated region body
PF: predicated region fallthrough
CT: control target
= control target key end

     0   :  { %s2188_s0 = inlined_call_operand.hbm [shape: f32[2,8,32], index: 0, kind: input, shape index: {}]   ;;  %s2189_s1 = inlined_call_operand.hbm [shape: f32[2,8,32], index: 1, kind: input, shape index: {}]   ;;  %s2190_s2 = inlined_call_operand.hbm [shape: f32[2,2,8,32], index: 2, kind: input, shape index: {}]   ;;  %s2191_s3 = inlined_call_operand.vmem [shape: f32[2,1,8], index: 3, kind: input, shape index: {}]   ;;  %s2192_s4 = inlined_call_operand.hbm [shape: f32[2,32,64], index: 4, kind: input, shape index: {}]   ;;  %s2193_s5 = inlined_call_operand.hbm [shape: f32[2,32,64], index: 5, kind: input, shape index: {}]   ;;  %s2194_s6 = inlined_call_operand.vmem [shape: f32[2,1,64], index: 6, kind: input, shape index: {}]   ;;  %s2195_s7 = inlined_call_operand.hbm [shape: f32[2,2,8,32], index: 7, kind: output, shape index: {}]  }
   0x1   :  { %2227 = sst [smem:[#allocation30_spill]] %s2188_s0 }
   0x2   :  { %2228 = sst [smem:[#allocation31_spill]] %s2189_s1 }
   0x3   :  { %2229 = sst [smem:[#allocation32_spill]] %s2191_s3 }
   0x4   :  { %2230 = sst [smem:[#allocation33_spill]] %s2192_s4 }
   0x5   :  { %2231 = sst [smem:[#allocation34_spill]] %s2194_s6 }
   0x6   :  { %2232 = sst [smem:[#allocation35_spill]] %s2195_s7 }
   0x7   :  { %12 = vsyncpa [#allocation3], 0 }
   0x8   :  { %14 = vsyncpa [#allocation3 + $0x1], 0 }
   0x9   :  { %15 = vsyncpa [#allocation6], 0 }
   0xa   :  { %17 = vsyncpa [#allocation6 + $0x1], 0 }
   0xb   :  { %18 = vsyncpa [#allocation9], 0 }
   0xc   :  { %20 = vsyncpa [#allocation9 + $0x1], 0 }
   0xd   :  { %21 = vsyncpa [#allocation4], 0 }
   0xe   :  { %23 = vsyncpa [#allocation4 + $0x1], 0  ;;  %s1660_s24 = smov 0   ;;  %s1662_s25 = smov 0  }
   0xf   :  { %s1664_s26 = smov 0   ;;  %s1666_s27 = smov 0  }
  0x10   :  { %s1668_s28 = smov 0   ;;  %s1670_s29 = smov 0  }
  0x11   :  { %s1672_s30 = smov 0   ;;  %s1674_s8 = smov 0  }
  0x12   :  { %s1676_s9 = smov 0   ;;  %s1678_s10 = smov 0  }
  0x13   :  { %s1680_s11 = smov 0   ;;  %s1682_s12 = smov 0  }
  0x14   :  { %s1684_s13 = smov 0   ;;  %s1686_s14 = smov 0  }
  0x15 LB: > { %2233 = sst [smem:[#allocation17_spill]] %s1559_s25  ;;  %s1729_s15 = sadd.s32 4294967295, %s1607_s14   ;;  %s1607_s14 = sphi %s1686_s14, %s29_s14   ;;  %s1603_s13 = sphi %s1684_s13, %s2315_s13   ;;  %s1599_s12 = sphi %s1682_s12, %s2314_s12   ;;  %s1595_s11 = sphi %s1680_s11, %s2313_s11   ;;  %s1591_s10 = sphi %s1678_s10, %s2312_s10   ;;  %s1587_s9 = sphi %s1676_s9, %s2311_s9   ;;  %s1583_s8 = sphi %s1674_s8, %s2310_s8   ;;  %s1579_s30 = sphi %s1672_s30, %s2303_s30   ;;  %s1575_s29 = sphi %s1670_s29, %s2309_s29   ;;  %s1571_s28 = sphi %s1668_s28, %s2308_s28   ;;  %s1567_s27 = sphi %s1666_s27, %s2307_s27   ;;  %s1563_s26 = sphi %s1664_s26, %s2302_s26   ;;  %s1559_s25 = sphi %s1662_s25, %s2301_s25   ;;  %s1555_s24 = sphi %s1660_s24, %s2300_s24  }
  0x16   : > { %2234 = sst [smem:[#allocation18_spill]] %s1563_s26  ;;  %p64_p0 = scmp.ne.s32.totalorder %s1587_s9, %s1583_s8 }
  0x17   : > { %2235 = sst [smem:[#allocation19_spill]] %s1583_s8  ;;  %p2203_p1 = scmp.eq.s32.totalorder %s1607_s14, 0 }
  0x18   : > { %2236 = sst [smem:[#allocation20_spill]] %s1591_s10  ;;  %p70_p2 = scmp.ne.s32.totalorder %s1583_s8, %s1579_s30 }
  0x19   : > { %2237 = sst [smem:[#allocation21_spill]] %s1595_s11  ;;  %p2201_p3 = scmp.eq.s32.totalorder %s1729_s15, 0 }
  0x1a   : > { %p66_p4 = por %p2203_p1, %p64_p0  ;;  %p2200_p5 = scmp.lt.s32.totalorder %s1607_s14, 4 }
  0x1b   : > { %p1743_p6 = por %p2201_p3, %p70_p2  ;;  %s2196_s19 = sand.u32 1, %s1587_s9  }
  0x1c   : > { %s1750_s20 = sshll.u32 %s2196_s19, 3  ;;  %s2198_s21 = sshll.u32 %s1603_s13, 7 }
  0x1d   : > { %s2238_s18 = scalar_select %p1743_p6, 1, 0 }
  0x1e   : > { %p1755_p7 = pnand %p2200_p5, %p66_p4  ;;  %s2202_s23 = sand.u32 1, %s1607_s14  }
  0x1f   : > { %2239 = sst [smem:[#allocation22_spill]] %s2238_s18  ;;  %s2241_s1 = sld [smem:[#allocation31_spill]] }
  0x20   : > { %s305_s19 = scalar_lea.vmem [#allocation5], %s1750_s20  ;;  %s1773_s3 = scalar_lea.sflag [#allocation6], %s2202_s23 }
  0x21   : > { %s312_s7 = sshll.u32 %s305_s19, 4  ;;  %2242 = sst [smem:[#allocation23_spill]] %s1773_s3  ;;  %s1768_s7 = int_to_ptr.vmem [resolvable:$true] %s312_s7 }
  0x22   : > { %p2215_p10 = pneg %p1755_p7 }
  0x25   : > { %s1765_s16 = scalar_lea.hbm %s2241_s1, %s2198_s21  ;;  %s1304_s21 = scalar_lea.hbm %s2241_s1, 256 }
  0x26   : > { %s1299_s6 = scalar_lea.hbm %s1765_s16, 128  ;;  %p1305_p13 = scmp.lt.u32.totalorder %s1765_s16, %s2241_s1 }
  0x27   : > { %p1300_p9 = scmp.ne.s32.totalorder %s1765_s16, %s1299_s6  ;;  %p1306_p0 = scmp.lt.u32.totalorder %s1304_s21, %s1299_s6 }
  0x28   : > { %p1308_p4 = scmp.lt.u32.totalorder %s1299_s6, %s1765_s16 }
  0x29   : > { %p1302_p11 = pnand %p2215_p10, %p1300_p9  ;;  %p1307_p2 = por %p1306_p0, %p1305_p13 }
  0x2b   : > { %p1303_p12 = pneg %p1302_p11  ;;  %p1309_p5 = por %p1308_p4, %p1307_p2 }
  0x2d   : > { %p1310_p3 = pnand %p1309_p5, %p1303_p12 }
  0x2f   : > { %1313 = shalt.err (!%p1310_p3)
}
  0x30   : > { %s1314_s23 = scalar_lea.vmem %s1768_s7, 128  ;;  %s1609_s17 = smov [#allocation5]  }
  0x31   : > { %p1315_p9 = scmp.ne.s32.totalorder %s1768_s7, %s1314_s23  ;;  %s1319_s30 = sshll.u32 %s1609_s17, 4  ;;  %s1320_s30 = int_to_ptr.vmem [resolvable:$false] %s1319_s30 }
  0x32   : > { %s1321_s11 = scalar_lea.vmem %s1320_s30, 256  ;;  %p1322_p8 = scmp.lt.s32.totalorder %s1768_s7, %s1320_s30 }
  0x33   : > { %p1317_p11 = pnand %p1315_p9, %p2215_p10  ;;  %p1323_p13 = scmp.lt.s32.totalorder %s1321_s11, %s1314_s23 }
  0x35   : > { %p1318_p1 = pneg %p1317_p11  ;;  %p1324_p0 = por %p1323_p13, %p1322_p8 }
  0x37   : > { %p1325_p2 = pnand %p1324_p0, %p1318_p1 }
  0x39   : > { %1328 = shalt.err (!%p1325_p2)
}
  0x3a   : > { %1162 = dma.hbm_to_vmem [thread:$0]  (!%p1755_p7), %s1765_s16, 128, %s1768_s7, %s1773_s3  }
  0x3b   : > { %p391_p1 = scmp.lt.s32.totalorder %s1607_s14, 5  ;;  %p2243_p3 = scmp.ge.s32.totalorder %s1607_s14, 1 }
  0x3c   : > { %s41_s21 = sadd.s32 1, %s1599_s12  ;;  %s163_s23 = sadd.s32 1, %s1563_s26 }
  0x3d   : > { %p1804_p5 = pnand %p2243_p3, %p391_p1  ;;  %p42_p8 = scmp.ge.s32.totalorder %s41_s21, 2 }
  0x3e   : > { %p170_p12 = scmp.ne.s32.totalorder %s1563_s26, %s1559_s25  ;;  %p176_p4 = scmp.ne.s32.totalorder %s1559_s25, %s1555_s24 }
  0x3f   : > { %s2244_s6 = scalar_select %p1804_p5, 1, 0 }
  0x40   : > { %s347_s19 = sand.u32 1, %s1563_s26   ;;  %s2317_s21 = smov (%p42_p8, %s41_s21), 0 }
  0x41   : > { %2245 = sst [smem:[#allocation24_spill]] %s2244_s6  ;;  %s2247_s7 = sadd.s32 1, %s1603_s13 }
  0x42   : > { %2246 = sst [smem:[#allocation25_spill]] %s2317_s21  ;;  %s2319_s7 = smov (!%p42_p8, %s2247_s7), %s1603_s13 }
  0x43   : > { %s106_s16 = ssub.s32 %s1599_s12, %s2317_s21  ;;  %p2248_p9 = scmp.eq.s32.totalorder %s1607_s14, 0 }
  0x44   : > { %p50_p13 = scmp.ge.s32.totalorder %s2319_s7, 2  ;;  %p161_p0 = scmp.eq.s32.totalorder %s106_s16, 0 }
  0x45   : > { %p1824_p11 = por %p170_p12, %p2248_p9  ;;  %p2250_p2 = scmp.eq.s32.totalorder %s1729_s15, 0 }
  0x46   : > { %s1834_s30 = sshll.u32 %s347_s19, 5  ;;  %s2321_s7 = smov (%p50_p13, %s2319_s7), 0 }
  0x47   : > { %p1830_p1 = por %p176_p4, %p2250_p2  ;;  %2253 = sst [smem:[#allocation27_spill]] %s2321_s7 }
  0x48   : > { %s1839_s11 = scalar_select %p161_p0, %s1563_s26, %s163_s23  }
  0x49   : > { %s2251_s24 = scalar_select %p1830_p1, 1, 0 }
  0x4a   : > { %2254 = sst [smem:[#allocation28_spill]] %s1839_s11  ;;  %s52_s1 = ssub.s32 %s1603_s13, %s2321_s7 }
  0x4b   : > { %2252 = sst [smem:[#allocation26_spill]] %s2251_s24  ;;  %p55_p3 = scmp.eq.s32.totalorder %s52_s1, 0 }
  0x4c   : > { %s108_s21 = sor.u32 %s106_s16, %s52_s1  ;;  %s2213_s25 = sshll.u32 %s1599_s12, 9 }
  0x4d   : > { %p1843_p8 = scmp.eq.s32.totalorder %s108_s21, 0  ;;  %s2256_s18 = sadd.s32 1, %s1587_s9 }
  0x4e   : > { %s1851_s8 = scalar_select %p55_p3, %s1587_s9, %s2256_s18  }
  0x4f   : > { %s2255_s10 = scalar_select %p1843_p8, 1, 0 }
  0x50   : > { %2257 = sst [smem:[#allocation29_spill]] %s1851_s8  ;;  %s2258_s4 = sld [smem:[#allocation33_spill]] }
  0x51   : > { %s349_s23 = scalar_lea.vmem [#allocation8], %s1834_s30  ;;  %p2259_p12 = scmp.lt.s32.totalorder %s1607_s14, 4 }
  0x52   : > { %s356_s1 = sshll.u32 %s349_s23, 4  ;;  %s2261_s18 = sand.u32 1, %s1607_s14   ;;  %s1861_s1 = int_to_ptr.vmem [resolvable:$true] %s356_s1 }
  0x53   : > { %p1867_p4 = pnand %p2259_p12, %p1824_p11  ;;  %s1873_s16 = scalar_lea.sflag [#allocation9], %s2261_s18 }
  0x55   : > { %s2260_s21 = scalar_select %p1867_p4, 1, 0 }
  0x56   : > { %s1858_s6 = scalar_lea.hbm %s2258_s4, %s2213_s25  ;;  %p2220_p13 = pneg %p1867_p4 }
  0x57   : > { %s1329_s24 = scalar_lea.hbm %s1858_s6, 512  ;;  %s1334_s23 = scalar_lea.hbm %s2258_s4, 1024 }
  0x58   : > { %p1330_p9 = scmp.ne.s32.totalorder %s1858_s6, %s1329_s24  ;;  %p1335_p11 = scmp.lt.u32.totalorder %s1858_s6, %s2258_s4 }
  0x59   : > { %p1336_p3 = scmp.lt.u32.totalorder %s1334_s23, %s1329_s24  ;;  %p1338_p10 = scmp.lt.u32.totalorder %s1329_s24, %s1858_s6 }
  0x5a   : > { %p1332_p0 = pnand %p2220_p13, %p1330_p9 }
  0x5b   : > { %p1337_p12 = por %p1336_p3, %p1335_p11 }
  0x5c   : > { %p1333_p2 = pneg %p1332_p0 }
  0x5d   : > { %p1339_p1 = por %p1338_p10, %p1337_p12 }
  0x5f   : > { %p1340_p6 = pnand %p1339_p1, %p1333_p2 }
  0x61   : > { %1343 = shalt.err (!%p1340_p6)
}
  0x62   : > { %s1344_s18 = scalar_lea.vmem %s1861_s1, 512  ;;  %s1610_s19 = smov [#allocation8]  }
  0x63   : > { %p1345_p9 = scmp.ne.s32.totalorder %s1861_s1, %s1344_s18  ;;  %s1349_s17 = sshll.u32 %s1610_s19, 4  ;;  %s1350_s17 = int_to_ptr.vmem [resolvable:$false] %s1349_s17 }
  0x64   : > { %s1351_s25 = scalar_lea.vmem %s1350_s17, 1024  ;;  %p1352_p8 = scmp.lt.s32.totalorder %s1861_s1, %s1350_s17 }
  0x65   : > { %p1347_p0 = pnand %p1345_p9, %p2220_p13  ;;  %p1353_p11 = scmp.lt.s32.totalorder %s1351_s25, %s1344_s18 }
  0x67   : > { %p1348_p5 = pneg %p1347_p0  ;;  %p1354_p3 = por %p1353_p11, %p1352_p8 }
  0x69   : > { %p1355_p10 = pnand %p1354_p3, %p1348_p5 }
  0x6b   : > { %1358 = shalt.err (!%p1355_p10)
}
  0x6c   : > { %s2223_s7 = smov 128   ;;  %s2224_s24 = smov 8  }
  0x6d   : > { %1168 = dma.hbm_to_vmem [thread:$0]  (!%p1867_p4), %s1858_s6, 512, %s1861_s1, %s1873_s16, %s2223_s7, %s2223_s7, %s2224_s24  }
  0x6e   : > { %s2262_s23 = sshll.u32 %s1599_s12, 9  ;;  %s370_s25 = scalar_lea.vmem [#allocation10], %s1834_s30 }
  0x6f   : > { %s1909_s17 = scalar_lea.hbm %s2193_s5, %s2262_s23  ;;  %s377_s4 = sshll.u32 %s370_s25, 4  ;;  %s1912_s4 = int_to_ptr.vmem [resolvable:$true] %s377_s4 }
  0x70   : > { %s2263_s8 = sshll.u32 %s1603_s13, 7  ;;  %s2264_s0 = sld [smem:[#allocation30_spill]] }
  0x71   : > { %s286_s6 = scalar_lea.vmem [#allocation2], %s1750_s20  ;;  %s2265_s18 = sand.u32 1, %s1587_s9  }
  0x72   : > { %s294_s1 = sshll.u32 %s286_s6, 4  ;;  %s283_s23 = scalar_lea.sflag [#allocation3], %s2265_s18  ;;  %s295_s1 = int_to_ptr.vmem [resolvable:$true] %s294_s1 }
  0x73   : > { %p2266_p5 = pneg %p1755_p7 }
  0x76   : > { %s1919_s3 = scalar_lea.hbm %s2264_s0, %s2263_s8  ;;  %s1364_s26 = scalar_lea.hbm %s2264_s0, 256 }
  0x77   : > { %s1359_s19 = scalar_lea.hbm %s1919_s3, 128  ;;  %p1365_p2 = scmp.lt.u32.totalorder %s1919_s3, %s2264_s0 }
  0x78   : > { %p1360_p6 = scmp.ne.s32.totalorder %s1919_s3, %s1359_s19  ;;  %p1366_p12 = scmp.lt.u32.totalorder %s1364_s26, %s1359_s19 }
  0x79   : > { %p1368_p0 = scmp.lt.u32.totalorder %s1359_s19, %s1919_s3 }
  0x7a   : > { %p1362_p1 = pnand %p1360_p6, %p2266_p5  ;;  %p1367_p9 = por %p1366_p12, %p1365_p2 }
  0x7c   : > { %p1363_p8 = pneg %p1362_p1  ;;  %p1369_p11 = por %p1368_p0, %p1367_p9 }
  0x7e   : > { %p1370_p3 = pnand %p1369_p11, %p1363_p8 }
  0x80   : > { %1373 = shalt.err (!%p1370_p3)
}
  0x81   : > { %s1374_s20 = scalar_lea.vmem %s295_s1, 128  ;;  %p2267_p6 = pmov %p2266_p5 }
  0x82   : > { %p1375_p10 = scmp.ne.s32.totalorder %s295_s1, %s1374_s20  ;;  %s1613_s6 = smov [#allocation2]  }
  0x83   : > { %s1379_s18 = sshll.u32 %s1613_s6, 4  ;;  %s1380_s18 = int_to_ptr.vmem [resolvable:$false] %s1379_s18 }
  0x84   : > { %p1377_p5 = pnand %p1375_p10, %p2267_p6  ;;  %s1381_s30 = scalar_lea.vmem %s1380_s18, 256 }
  0x85   : > { %p1382_p13 = scmp.lt.s32.totalorder %s295_s1, %s1380_s18  ;;  %p1383_p4 = scmp.lt.s32.totalorder %s1381_s30, %s1374_s20 }
  0x86   : > { %p1378_p1 = pneg %p1377_p5 }
  0x87   : > { %p1384_p2 = por %p1383_p4, %p1382_p13 }
  0x89   : > { %p1385_p12 = pnand %p1384_p2, %p1378_p1 }
  0x8b   : > { %1388 = shalt.err (!%p1385_p12)
}
  0x8c   : > { %1159 = dma.hbm_to_vmem [thread:$0]  (!%p1755_p7), %s1919_s3, 128, %s295_s1, %s283_s23  }
  0x8d   : > { %s1049_s19 = sadd.s32 4294967294, %s1607_s14   ;;  %s111_s25 = sadd.s32 1, %s1575_s29 }
  0x8e   : > { %p2268_p4 = scmp.ne.s32.totalorder %s2255_s10, 0  ;;  %p118_p13 = scmp.ne.s32.totalorder %s1575_s29, %s1571_s28 }
  0x8f   : > { %p124_p8 = scmp.ne.s32.totalorder %s1571_s28, %s1567_s27  ;;  %p256_p9 = scmp.eq.s32.totalorder %s1729_s15, 3 }
  0x90   : > { %s1948_s22 = scalar_select %p2268_p4, %s1575_s29, %s111_s25  }
  0x91   : > { %p262_p0 = scmp.eq.s32.totalorder %s1049_s19, 3  ;;  %p2269_p11 = scmp.eq.s32.totalorder %s1607_s14, 0 }
  0x92   : > { %p2271_p10 = scmp.eq.s32.totalorder %s1729_s15, 0  ;;  %p1967_p6 = por %p256_p9, %p118_p13 }
  0x93   : > { %p1957_p3 = por %p118_p13, %p2269_p11  ;;  %p1971_p5 = por %p262_p0, %p124_p8 }
  0x94   : > { %p1963_p7 = por %p124_p8, %p2271_p10  ;;  %s321_s23 = sand.u32 1, %s1575_s29  }
  0x95   : > { %s2273_s10 = scalar_select %p1967_p6, 1, 0 }
  0x96   : > { %s2272_s3 = scalar_select %p1963_p7, 1, 0 }
  0x97   : > { %s2274_s1 = scalar_select %p1971_p5, 1, 0 }
  0x98   : > { %s1057_s8 = sshll.u32 %s1599_s12, 1  ;;  %s1056_s11 = sshll.u32 %s321_s23, 3 }
  0x99   : > { %s328_s20 = sadd.s32 %s1603_s13, %s1057_s8  ;;  %s323_s25 = scalar_lea.vmem [#allocation7], %s1056_s11 }
  0x9a   : > { %s1058_s6 = sshll.u32 %s328_s20, 7  ;;  %s332_s7 = sshll.u32 %s323_s25, 4  ;;  %s1983_s7 = int_to_ptr.vmem [resolvable:$true] %s332_s7 }
  0x9b   : > { %s1981_s19 = scalar_lea.hbm %s2190_s2, %s1058_s6  ;;  %p2275_p1 = scmp.lt.s32.totalorder %s1607_s14, 4 }
  0x9c   : > { %s1389_s0 = scalar_lea.hbm %s1909_s17, 512  ;;  %p2277_p4 = scmp.ne.s32.totalorder %s2260_s21, 0 }
  0x9d   : > { %p1989_p2 = pnand %p2275_p1, %p1957_p3  ;;  %p1390_p12 = scmp.ne.s32.totalorder %s1909_s17, %s1389_s0 }
  0x9e   : > { %p2278_p13 = pneg %p2277_p4  ;;  %s1394_s20 = scalar_lea.hbm %s2193_s5, 1024 }
  0x9f   : > { %p1395_p0 = scmp.lt.u32.totalorder %s1909_s17, %s2193_s5  ;;  %p1396_p11 = scmp.lt.u32.totalorder %s1394_s20, %s1389_s0 }
  0xa0   : > { %p1392_p8 = pnand %p1390_p12, %p2278_p13  ;;  %p1398_p3 = scmp.lt.u32.totalorder %s1389_s0, %s1909_s17 }
  0xa1   : > { %p1397_p10 = por %p1396_p11, %p1395_p0 }
  0xa2   : > { %p1393_p9 = pneg %p1392_p8 }
  0xa3   : > { %p1399_p1 = por %p1398_p3, %p1397_p10 }
  0xa5   : > { %p1400_p5 = pnand %p1399_p1, %p1393_p9 }
  0xa7   : > { %1403 = shalt.err (!%p1400_p5)
}
  0xa8   : > { %s1404_s26 = scalar_lea.vmem %s1912_s4, 512  ;;  %s1614_s18 = smov [#allocation10]  }
  0xa9   : > { %p1405_p12 = scmp.ne.s32.totalorder %s1912_s4, %s1404_s26  ;;  %s1409_s30 = sshll.u32 %s1614_s18, 4  ;;  %s1410_s30 = int_to_ptr.vmem [resolvable:$false] %s1409_s30 }
  0xaa   : > { %s1411_s25 = scalar_lea.vmem %s1410_s30, 1024  ;;  %p1412_p7 = scmp.lt.s32.totalorder %s1912_s4, %s1410_s30 }
  0xab   : > { %p1407_p8 = pnand %p1405_p12, %p2278_p13  ;;  %p1413_p0 = scmp.lt.s32.totalorder %s1411_s25, %s1404_s26 }
  0xad   : > { %p1408_p6 = pneg %p1407_p8  ;;  %p1414_p11 = por %p1413_p0, %p1412_p7 }
  0xaf   : > { %p1415_p10 = pnand %p1414_p11, %p1408_p6 }
  0xb1   : > { %1418 = shalt.err (!%p1415_p10)
}
  0xb2   : > { %s2279_s0 = smov 8   ;;  %s2280_s23 = smov 128  }
  0xb3   : > { %1171 = dma.hbm_to_vmem [thread:$0]  (!%p2277_p4), %s1909_s17, 512, %s1912_s4, %s1873_s16, %s2280_s23, %s2280_s23, %s2279_s0  }
  0xb4   : > { %s1419_s8 = scalar_lea.hbm %s1981_s19, 128  ;;  %p1421_p7 = pneg %p1989_p2 }
  0xb5   : > { %p1420_p5 = scmp.ne.s32.totalorder %s1981_s19, %s1419_s8  ;;  %s1424_s11 = scalar_lea.hbm %s2190_s2, 512 }
  0xb6   : > { %p1425_p3 = scmp.lt.u32.totalorder %s1981_s19, %s2190_s2  ;;  %p1426_p1 = scmp.lt.u32.totalorder %s1424_s11, %s1419_s8 }
  0xb7   : > { %p1422_p6 = pnand %p1421_p7, %p1420_p5  ;;  %p1428_p13 = scmp.lt.u32.totalorder %s1419_s8, %s1981_s19 }
  0xb8   : > { %p1427_p12 = por %p1426_p1, %p1425_p3 }
  0xb9   : > { %p1423_p9 = pneg %p1422_p6 }
  0xba   : > { %p1429_p4 = por %p1428_p13, %p1427_p12 }
  0xbc   : > { %p1430_p8 = pnand %p1429_p4, %p1423_p9 }
  0xbe   : > { %1433 = shalt.err (!%p1430_p8)
}
  0xbf   : > { %s1434_s4 = scalar_lea.vmem %s1983_s7, 128  ;;  %s1615_s16 = smov [#allocation7]  }
  0xc0   : > { %p1435_p0 = scmp.ne.s32.totalorder %s1983_s7, %s1434_s4  ;;  %s1439_s17 = sshll.u32 %s1615_s16, 4  ;;  %s1440_s17 = int_to_ptr.vmem [resolvable:$false] %s1439_s17 }
  0xc1   : > { %s1441_s18 = scalar_lea.vmem %s1440_s17, 256  ;;  %p1442_p5 = scmp.lt.s32.totalorder %s1983_s7, %s1440_s17 }
  0xc2   : > { %p1437_p11 = pnand %p1435_p0, %p1421_p7  ;;  %p1443_p6 = scmp.lt.s32.totalorder %s1441_s18, %s1434_s4 }
  0xc4   : > { %p1438_p10 = pneg %p1437_p11  ;;  %p1444_p3 = por %p1443_p6, %p1442_p5 }
  0xc6   : > { %p1445_p1 = pnand %p1444_p3, %p1438_p10 }
  0xc8   : > { %1448 = shalt.err (!%p1445_p1)
}
  0xc9   : > { %s2281_s30 = sld [smem:[#allocation23_spill]]  ;;  %s2282_s25 = sld [smem:[#allocation24_spill]] }
  0xcf   : > { %1165 = dma.hbm_to_vmem [thread:$0]  (!%p1989_p2), %s1981_s19, 128, %s1983_s7, %s2281_s30  }
  0xd0   : > { %p2283_p9 = scmp.ne.s32.totalorder %s2282_s25, 0 }
  0xd1   : > { %s2284_s0 = sld [smem:[#allocation19_spill]] (!%p2283_p9)  ;;  %s2285_s23 = sld [smem:[#allocation22_spill]] (!%p2283_p9) }
  0xd2   : > { %395 = sbr.rel (%p2283_p9) target bundleno = 1220 (0x4c4), region = 48 }
  0xd7   : > { %s397_s8 = sand.u32 (!%p2283_p9), 1, %s2284_s0   ;;  %p2286_p7 = scmp.ne.s32.totalorder (!%p2283_p9), %s2285_s23, 0 }
  0xd8   : > { %s2049_s21 = sshll.u32 (!%p2283_p9), %s397_s8, 3  ;;  %s398_s20 = scalar_lea.sflag (!%p2283_p9), [#allocation3], %s397_s8 }
  0xd9   : > { %s401_s11 = scalar_lea.vmem [#allocation2], %s2049_s21 }
  0xda   : > { %1534 = dma.done.wait (%p2286_p7), %s398_s20, 128  }
  0xdb   : > { %1536 = vsyncadd (%p2286_p7), %s398_s20, 4294967168  ;;  %s406_s7 = sand.u32 1, %s1729_s15   ;;  %s410_s19 = scalar_lea.vmem [#allocation5], %s2049_s21 }
  0xdc   : > { %s407_s24 = scalar_lea.sflag [#allocation6], %s406_s7 }
  0xdd   : > { %1538 = dma.done.wait (%p2286_p7), %s407_s24, 128  }
  0xde   : > { %1540 = vsyncadd (%p2286_p7), %s407_s24, 4294967168  ;;  %s417_s6 = sand.u32 1, %s1571_s28   ;;  %p2287_p2 = scmp.ne.s32.totalorder %s2272_s3, 0 }
  0xdf   : > { %s2065_s26 = sshll.u32 %s417_s6, 3 }
  0xe0   : > { %s419_s4 = scalar_lea.vmem [#allocation7], %s2065_s26 }
  0xe1   : > { %1542 = dma.done.wait (%p2287_p2), %s407_s24, 128  }
  0xe2   : > { %1544 = vsyncadd (%p2287_p2), %s407_s24, 4294967168  ;;  %s2288_s15 = sld [smem:[#allocation17_spill]]  ;;  %s2289_s16 = sld [smem:[#allocation26_spill]] }
  0xe3   : > { %s425_s30 = scalar_lea.sflag [#allocation9], %s406_s7 }
  0xe8   : > { %s426_s17 = sand.u32 1, %s2288_s15   ;;  %p2290_p12 = scmp.ne.s32.totalorder %s2289_s16, 0 }
  0xe9   : > { %s1069_s18 = sshll.u32 %s426_s17, 5 }
  0xea   : > { %s428_s25 = scalar_lea.vmem [#allocation8], %s1069_s18 }
  0xeb   : > { %1546 = dma.done.wait (%p2290_p12), %s425_s30, 1024  }
  0xec   : > { %1548 = vsyncadd (%p2290_p12), %s425_s30, 4294966272  ;;  %v1616_v0 = vmov 0.0|0.0   ;;  %vm1617_vm0 = vmmov 0   ;;  %v1618_v1 = vmov 0.0   ;;  %s437_s3 = scalar_lea.vmem [#allocation10], %s1069_s18  ;;  %v502_v7 = vld [vmem:[%s428_s25] sm:$0xff] }
  0xed   : > { %1138 = vmatprep.subr.bf16.mxu1 %v1616_v0  ;;  %1132 = vmatprep.subr.bf16.mxu0 %v1616_v0  ;;  %v506_v2 = vld [vmem:[%s437_s3] sm:$0xff]  ;;  %v507_v3 = vld [vmem:[%s437_s3 + $0x8] sm:$0xff]  ;;  %v508_v4 = vld [vmem:[%s437_s3 + $0x10] sm:$0xff]  ;;  %s2291_s0 = sld [smem:[#allocation20_spill]]  ;;  %vm511_vm1 = vcmask 261120   ;;  %s2292_s23 = sld [smem:[#allocation21_spill]] }
  0xee   : > { %1119 = vmatprep.mubr.msk.f32.mxu1 %vm1617_vm0, %v1618_v1  ;;  %1108 = vmatprep.mubr.msk.f32.mxu0 %vm1617_vm0, %v1618_v1  ;;  %v1139_v5 = vpack.c.bf16 %v507_v3, %v506_v2  ;;  %v509_v6 = vld [vmem:[%s437_s3 + $0x18] sm:$0xff]  ;;  %v503_v8 = vld [vmem:[%s428_s25 + $0x8] sm:$0xff]  ;;  %v504_v10 = vld [vmem:[%s428_s25 + $0x10] sm:$0xff]  ;;  %s2293_s24 = sld [smem:[#allocation34_spill]]  ;;  %vm673_vm2 = vcmask 523264   ;;  %s2294_s16 = sld [smem:[#allocation32_spill]] }
  0xef   : > { %v1133_v9 = vpack.c.bf16 %v503_v8, %v502_v7  ;;  %v505_v11 = vld [vmem:[%s428_s25 + $0x18] sm:$0xff]  ;;  %v1142_v12 = vpack.c.bf16 %v509_v6, %v508_v4  ;;  %v501_v14 = vld [vmem:[%s410_s19] sm:$0xff]  ;;  %vm750_vm3 = vcmask 64512   ;;  %s493_s3 = scalar_lea.vmem [#allocation11], %s2065_s26  ;;  %p2297_p0 = scmp.ne.s32.totalorder %s2273_s10, 0 }
  0xf0   : > { %1140 = vmatpush3.bf16.msra.mxu1 %v1139_v5  ;;  %v1136_v13 = vpack.c.bf16 %v505_v11, %v504_v10  ;;  %v500_v15 = vld [vmem:[%s401_s11] sm:$0xff]  ;;  %s1619_s26 = smov [#allocation11]  }
  0xf1   : > { %1141 = vmatprep.subr.bf16.mxu1 %v1616_v0  ;;  %1134 = vmatpush3.bf16.msra.mxu0 %v1133_v9  ;;  %v762_v34 = vld [vmem:[%s419_s4] sm:$0xff]  ;;  %s838_s4 = scalar_lea.sflag [#allocation4], %s417_s6 }
  0xf2   : > { %1135 = vmatprep.subr.bf16.mxu0 %v1616_v0 }
  0xf3   : > { %p497_p13 = scmp.lt.s32.totalorder %s2291_s0, 1  ;;  %p494_p4 = scmp.lt.s32.totalorder %s2292_s23, 1 }
  0xf4   : > { %1143 = vmatpush3.bf16.msra.mxu1 %v1142_v12  ;;  %s1080_s18 = sshll.u32 %s2291_s0, 1 }
  0xf5   : > { %1137 = vmatpush3.bf16.msra.mxu0 %v1136_v13  ;;  %1127 = vmatprep.subr.mxu1 %v1618_v1  ;;  %s498_s8 = scalar_select %p497_p13, %s2291_s0, 1 }
  0xf6   : > { %1122 = vmatprep.subr.mxu0 %v1618_v1  ;;  %s495_s21 = scalar_select %p494_p4, %s2292_s23, 1 }
  0xf7   : > { %1120 = vmatmul.mubr.msk.f32.vlgmr.msra.gmra.mrb[0].mxu1 %vm511_vm1, %v501_v14  ;;  %s499_s19 = scalar_lea.vmem %s2293_s24, %s498_s8  ;;  %s850_s30 = sadd.s32 %s2292_s23, %s1080_s18 }
  0xf8   : > { %1109 = vmatmul.mubr.msk.f32.vlgmr.msra.gmra.mrb[0].mxu0 %vm511_vm1, %v500_v15  ;;  %1129 = vmatprep.mubr.msk.f32.mxu1 %vm1617_vm0, %v1618_v1  ;;  %v1073_v16 = vld [vmem:[%s499_s19] ss:$0 sm:$0xff]  ;;  %s496_s17 = scalar_lea.vmem %s2294_s16, %s495_s21  ;;  %s1081_s25 = sshll.u32 %s850_s30, 7 }
  0xf9   : > { %1124 = vmatprep.mubr.msk.f32.mxu0 %vm1617_vm0, %v1618_v1  ;;  %v1075_v24 = vld [vmem:[%s496_s17] ss:$0 sm:$0xff]  ;;  %1128 = vmatpush3.msra.mxu1 %v762_v34  ;;  %s854_s8 = sshll.u32 %s493_s3, 4  ;;  %s2295_s24 = sld [smem:[#allocation35_spill]]  ;;  %s2110_s8 = int_to_ptr.vmem [resolvable:$true] %s854_s8 }
  0xfa   : > { %s1449_s0 = scalar_lea.vmem %s2110_s8, 128  ;;  %s1453_s23 = sshll.u32 %s1619_s26, 4  ;;  %s1454_s23 = int_to_ptr.vmem [resolvable:$false] %s1453_s23 }
  0xfb   : > { %p1450_p8 = scmp.ne.s32.totalorder %s2110_s8, %s1449_s0  ;;  %s1455_s11 = scalar_lea.vmem %s1454_s23, 256 }
  0xfc   : > { %p1456_p5 = scmp.lt.s32.totalorder %s2110_s8, %s1454_s23  ;;  %p1457_p6 = scmp.lt.s32.totalorder %s1455_s11, %s1449_s0 }
  0xfd   : > { %p1451_p11 = pnand %p1450_p8, %p2297_p0 }
  0xfe   : > { %p1458_p3 = por %p1457_p6, %p1456_p5 }
  0xff   : > { %s2296_s19 = smov %s2295_s24  ;;  %s2108_s21 = scalar_lea.hbm %s2295_s24, %s1081_s25 }
 0x100   : > { %p1452_p10 = pneg %p1451_p11 }
 0x102   : > { %p1459_p1 = pnand %p1458_p3, %p1452_p10 }
 0x1ca   : > { %v661_v17 = vpop.f32.mrb[0].mxu1 }
 0x1cb   : > { %v662_v18 = vadd.f32 %v1073_v16, %v661_v17  ;;  %v1121_v19 = vpop.f32.mrb[1].mxu1  ;;  %v581_v20 = vpop.f32.mrb[0].mxu0 }
 0x1cc   : > { %v1110_v21 = vpop.f32.mrb[1].mxu0  ;;  %v585_v23 = vmax.f32 %v581_v20, 0.0 }
 0x1cd   : > { %v665_v22 = vmax.f32 %v662_v18, 0.0 }
 0x1cf   : > { %1123 = vmatpush3.xpose.msk.msra.mxu0 %vm673_vm2, %v665_v22 }
 0x1d2   : > { %1125 = vmatmul.mubr.msk.f32.vlgmr.msra.gmra.mrb[2].mxu0 %vm673_vm2, %v585_v23 }
 0x2a5   : > { %v746_v25 = vpop.f32.mrb[2].mxu0 }
 0x2a6   : > { %v747_v26 = vadd.f32 %v1075_v24, %v746_v25  ;;  %v1126_v27 = vpop.f32.mrb[3].mxu0 }
 0x2a8   : > { %v751_v28 = vsel %vm750_vm3, %v747_v26, -inf }
 0x2a9   : > { %752 = vmax.xlane.f32.xlu0 %v751_v28 }
 0x336   : > { %v753_v29 = vpop.xlane.xlu0 %752 }
 0x337   : > { %v754_v30 = vsub.f32 %v747_v26, %v753_v29 }
 0x339   : > { %v755_v31 = vmul.f32 1.442695, %v754_v30 }
 0x33b   : > { %1295 = vpow2.f32 %v755_v31 }
 0x345   : > { %v1296_v32 = vpop.eup %1295 }
 0x346   : > { %v757_v33 = vsel %vm750_vm3, %v1296_v32, 0.0 }
 0x347   : > { %758 = vadd.xlane.f32.xlu0 %v757_v33 }
 0x3d4   : > { %v759_v35 = vpop.xlane.xlu0 %758 }
 0x3d5   : > { %1297 = vrcp.f32 %v759_v35 }
 0x3df   : > { %v1298_v36 = vpop.eup %1297 }
 0x3e0   : > { %v761_v37 = vmul.f32 %v1298_v36, %v1296_v32 }
 0x3e2   : > { %1130 = vmatmul.mubr.msk.f32.vlgmr.msra.gmra.mrb[2].mxu1 %vm750_vm3, %v761_v37 }
 0x4b5   : > { %v832_v38 = vpop.f32.mrb[2].mxu1 }
 0x4b6   : > { %836 = vst.msk [vmem:[%s493_s3] sm:$0xff] %vm511_vm1, %v832_v38  ;;  %v1131_v39 = vpop.f32.mrb[3].mxu1 }
 0x4b7   : > { %1462 = shalt.err (!%p1459_p1)
}
 0x4b8   : > { %s1463_s6 = scalar_lea.hbm %s2108_s21, 128  ;;  %s1467_s17 = scalar_lea.hbm %s2296_s19, 512 }
 0x4b9   : > { %p1464_p9 = scmp.ne.s32.totalorder %s2108_s21, %s1463_s6  ;;  %p1468_p12 = scmp.lt.u32.totalorder %s2108_s21, %s2296_s19 }
 0x4ba   : > { %p1469_p13 = scmp.lt.u32.totalorder %s1467_s17, %s1463_s6  ;;  %p1471_p8 = scmp.lt.u32.totalorder %s1463_s6, %s2108_s21 }
 0x4bb   : > { %p1465_p7 = pnand %p1464_p9, %p2297_p0 }
 0x4bc   : > { %p1470_p4 = por %p1469_p13, %p1468_p12 }
 0x4bd   : > { %p1466_p2 = pneg %p1465_p7 }
 0x4be   : > { %p1472_p11 = por %p1471_p8, %p1470_p4 }
 0x4c0   : > { %p1473_p10 = pnand %p1472_p11, %p1466_p2 }
 0x4c2   : > { %1476 = shalt.err (!%p1473_p10)
}
 0x4c3   : > { %1154 = dma.vmem_to_hbm [thread:$0]  (%p2297_p0), %s2110_s8, 128, %s2108_s21, %s838_s4  }
 0x4c4 PF: > { %p1177_p5 = scmp.ge.s32.totalorder %s1607_s14, 2  ;;  %s866_s25 = sand.u32 1, %s1567_s27  }
 0x4c5   : > { %p2298_p6 = scmp.ne.s32.totalorder %s2274_s1, 0  ;;  %s867_s3 = scalar_lea.sflag [#allocation4], %s866_s25 }
 0x4c7   : > { %p1173_p3 = pnand %p1177_p5, %p2298_p6 }
 0x4c9   : > { %1550 = dma.done.wait (!%p1173_p3), %s867_s3, 128  }
 0x4ca   : > { %1552 = vsyncadd (!%p1173_p3), %s867_s3, 4294967168  ;;  %s29_s14 = sadd.s32 1, %s1607_s14   ;;  %s2300_s24 = sld [smem:[#allocation17_spill]] }
 0x4cb   : > { %p2141_p1 = scmp.ge.s32.totalorder %s29_s14, 6   ;;  %s2301_s25 = sld [smem:[#allocation18_spill]] }
 0x4cc   : > { %s2302_s26 = sld [smem:[#allocation28_spill]]  ;;  %s2303_s30 = sld [smem:[#allocation19_spill]] }
 0x4cd   : > { %s2304_s10 = sld [smem:[#allocation29_spill]]  ;;  %s2305_s1 = sld [smem:[#allocation25_spill]] }
 0x4ce   : > { %s2306_s7 = sld [smem:[#allocation27_spill]]  ;;  %s2307_s27 = smov %s1571_s28 }
 0x4cf   : > { %s2308_s28 = smov %s1575_s29  ;;  %s2309_s29 = smov %s1948_s22 }
 0x4d0   : > { %s2310_s8 = smov %s1587_s9  ;;  %s2313_s11 = smov %s1603_s13 }
 0x4d1   :  { %28 = sbr.rel (!%p2141_p1) target bundleno = 21 (0x15), region = 147 }
 0x4d3   : > { %s2311_s9 = smov %s2304_s10  ;;  %s2312_s10 = smov %s1599_s12 }
 0x4d4   : > { %s2314_s12 = smov %s2305_s1  ;;  %s2315_s13 = smov %s2306_s7 }
 0x4d8   :  { %872 = vsyncpa [#allocation3], 1 }
 0x4d9   :  { %874 = vsyncpa [#allocation3 + $0x1], 1 }
 0x4da   :  { %875 = vsyncpa [#allocation6], 1 }
 0x4db   :  { %877 = vsyncpa [#allocation6 + $0x1], 1 }
 0x4dc   :  { %878 = vsyncpa [#allocation9], 1 }
 0x4dd   :  { %880 = vsyncpa [#allocation9 + $0x1], 1 }
 0x4de   :  { %881 = vsyncpa [#allocation4], 1 }
 0x4df   :  { %883 = vsyncpa [#allocation4 + $0x1], 1 }

</bundles_post_ra>
